<compile_context>
chip_gen: v6e
topology: v6e:2x2x1
jax: 0.10.0
libtpu: 0.0.40
codegen_flags: <defaults>
</compile_context>

<pallas_src>
import functools

import jax
import jax.numpy as jnp
from jax.experimental import pallas as pl
from jax.experimental.pallas import tpu as pltpu


def _round_up(n, m):
    return ((n + m - 1) // m) * m


def _choose_time_block(seq_len, tb):
    """Pick a time-block size.

    Prefer a divisor of seq_len (no time padding).  If seq_len has no decent
    divisor <= 64 (e.g. prime T), return a fixed block of 32 and let the
    wrapper zero-pad the time axis instead of degrading to one grid step per
    timestep.
    """
    if tb is not None:
        return tb
    max_tb = 64
    if seq_len <= max_tb:
        return max(seq_len, 1)
    best = 1
    for d in range(1, max_tb + 1):
        if seq_len % d == 0:
            best = d
    if best >= 8:
        return best
    return 32  # awkward / prime T: pad the time axis up to a multiple of 32


def _ctrnn_kernel(x_ref, win_ref, wh_ref, h0_ref, out_ref, h_carry,
                  *, alpha, tb, b):
    """One grid step = `tb` timesteps of the recurrence.

    x_ref   : (tb*b, I)   flattened (time, batch) input chunk
    win_ref : (I, H)      W_in^T (zero-padded to H lanes)
    wh_ref  : (H, H)      W_h^T  (zero-padded)
    h0_ref  : (b, H)      initial hidden (padded, f32)
    out_ref : (tb*b, H)   hidden states for this time block (flattened, f32)
    h_carry : (b, H)      VMEM scratch — hidden carry, persists across grid
    """
    g = pl.program_id(0)

    # Initialize the resident hidden carry from h0 on the first time block.
    @pl.when(g == 0)
    def _():
        h_carry[...] = h0_ref[...]

    # Hoisted input projection for the whole time block, written straight into
    # the output block (no xp scratch): one (tb*b, I) @ (I, H) MXU matmul.
    out_ref[...] = jnp.dot(x_ref[...], win_ref[...],
                           preferred_element_type=jnp.float32)

    # Load W_h^T once per grid step so its staging is hoisted out of the
    # serial time loop.  (Further option: drive the MXU explicitly with
    # pltpu.matmul_push_rhs once per block + matmul_acc_lhs/pop per step.)
    wh = wh_ref[...]
    one_minus_alpha = 1.0 - alpha

    def step(t, h):
        row = pl.multiple_of(t * b, b)
        pre = out_ref[pl.ds(row, b), :] + jnp.dot(
            h.astype(wh.dtype), wh, preferred_element_type=jnp.float32)
        # sigmoid(z) = 0.5 * tanh(z/2) + 0.5 : one EUP transcendental per step
        # (exp + divide is two EUP passes on the serial critical path).
        h_sig = 0.5 * jnp.tanh(0.5 * pre) + 0.5
        h_new = h * one_minus_alpha + h_sig * alpha
        out_ref[pl.ds(row, b), :] = h_new
        return h_new

    # Bounded unroll: steps are serially dependent, so unrolling past ~8 only
    # inflates instruction memory / compile time.
    h_carry[...] = jax.lax.fori_loop(0, tb, step, h_carry[...],
                                     unroll=min(tb, 8))


def ctrnn_forward(x, w_in, w_h, initial_hidden, alpha, hidden=None, tb=None,
                  matmul_dtype=jnp.float32):
    """CTRNN forward pass.

    x              : (T, B, I) float32, time-major (matches the PyTorch module)
    w_in           : (H, I)  input2h.weight (PyTorch layout)
    w_h            : (H, H)  h2h.weight     (PyTorch layout)
    initial_hidden : (1, H)
    matmul_dtype   : dtype for MXU operands (jnp.bfloat16 doubles MXU rate and
                     halves weight VMEM at large H; carry/accumulate stay f32).
    Returns (output (T, B, H), final hidden (B, H)).
    """
    T, B, I = x.shape
    H = w_h.shape[0]
    if hidden is None:
        hidden = jnp.broadcast_to(initial_hidden, (B, H))

    tb = _choose_time_block(T, tb)
    t_pad = _round_up(T, tb)
    b_pad = _round_up(B, 8)      # sublane-dense
    h_pad = _round_up(H, 128)    # lane-dense

    # Glue: transpose to matmul-friendly layout and zero-pad.  Zero padding is
    # exact for the real columns: padded rows of W_h^T are zero, so junk in
    # padded hidden lanes never feeds back into real ones.  Padded tail
    # timesteps (zero input) come after the last real step and are sliced off.
    w_in_t = jnp.pad(w_in.T.astype(matmul_dtype), ((0, 0), (0, h_pad - H)))
    w_h_t = jnp.pad(w_h.T.astype(matmul_dtype),
                    ((0, h_pad - H), (0, h_pad - H)))
    h0 = jnp.pad(hidden.astype(jnp.float32),
                 ((0, b_pad - B), (0, h_pad - H)))
    x_p = jnp.pad(x.astype(matmul_dtype),
                  ((0, t_pad - T), (0, b_pad - B), (0, 0)))
    x2d = x_p.reshape(t_pad * b_pad, I)

    kernel = functools.partial(_ctrnn_kernel, alpha=float(alpha), tb=tb,
                               b=b_pad)

    # Explicit VMEM budget (double-buffered blocks + scratch, with headroom),
    # clamped to stay inside v7x's 64 MiB physical VMEM.
    op_bytes = jnp.dtype(matmul_dtype).itemsize
    block_bytes = (tb * b_pad * I * op_bytes      # x chunk
                   + I * h_pad * op_bytes         # W_in^T
                   + h_pad * h_pad * op_bytes     # W_h^T
                   + b_pad * h_pad * 4            # h0
                   + tb * b_pad * h_pad * 4)      # out block
    vmem_limit = int(min(64 * 1024 * 1024,
                         max(16 * 1024 * 1024,
                             2 * block_bytes + b_pad * h_pad * 4 + (1 << 20))))

    out2d = pl.pallas_call(
        kernel,
        out_shape=jax.ShapeDtypeStruct((t_pad * b_pad, h_pad), jnp.float32),
        grid_spec=pltpu.PrefetchScalarGridSpec(
            num_scalar_prefetch=0,
            grid=(t_pad // tb,),
            in_specs=[
                pl.BlockSpec((tb * b_pad, I), lambda g: (g, 0)),   # x chunk
                pl.BlockSpec((I, h_pad), lambda g: (0, 0)),        # W_in^T
                pl.BlockSpec((h_pad, h_pad), lambda g: (0, 0)),    # W_h^T
                pl.BlockSpec((b_pad, h_pad), lambda g: (0, 0)),    # h0
            ],
            out_specs=pl.BlockSpec((tb * b_pad, h_pad), lambda g: (g, 0)),
            scratch_shapes=[pltpu.VMEM((b_pad, h_pad), jnp.float32)],  # carry
        ),
        compiler_params=pltpu.CompilerParams(
            dimension_semantics=("arbitrary",),   # time recurrence is serial
            vmem_limit_bytes=vmem_limit,
        ),
    )(x2d, w_in_t, w_h_t, h0)

    out = out2d.reshape(t_pad, b_pad, h_pad)[:T, :B, :H]
    # Final hidden = hidden after the last *real* timestep (robust to T padding).
    h_final = out[T - 1]
    return out, h_final


def make_ctrnn_params(key, input_size, hidden_size):
    """Deterministic synthetic parameters matching the PyTorch __init__."""
    k1, k2, k3 = jax.random.split(key, 3)
    # nn.Linear weights stored as (out, in); init.normal_ with the given std.
    w_in = jax.random.normal(k1, (hidden_size, input_size), jnp.float32) * 0.5
    w_h = jax.random.normal(k2, (hidden_size, hidden_size), jnp.float32) * (
        1.0 / jnp.sqrt(hidden_size))
    # initial_hidden ~ U(0,1)*2 - 1, shape (1, hidden_size)
    initial_hidden = (jax.random.uniform(k3, (1, hidden_size), jnp.float32)
                      * 2.0 - 1.0)
    return w_in, w_h, initial_hidden


def ctrnn_reference(x, w_in, w_h, initial_hidden, alpha):
    """Pure-JAX reference reproducing the PyTorch forward (for verification)."""
    T, B, I = x.shape
    h = jnp.broadcast_to(initial_hidden, (B, initial_hidden.shape[1]))

    def step(h, x_t):
        h_sig = jax.nn.sigmoid(x_t @ w_in.T + h @ w_h.T)
        h_new = h * (1.0 - alpha) + h_sig * alpha
        return h_new, h_new

    h_final, outs = jax.lax.scan(step, h, x)
    return outs, h_final


if __name__ == "__main__":
    # Small shapes consistent with the module: seq=8, batch=2, input=4, hidden=32
    seq_len, batch, input_size, hidden_size = 8, 2, 4, 32
    tau, dt = 50.0, 1.0
    alpha = dt / tau

    key = jax.random.PRNGKey(0)
    kx, kp = jax.random.split(key)
    x = jax.random.normal(kx, (seq_len, batch, input_size), jnp.float32)

    w_in, w_h, initial_hidden = make_ctrnn_params(kp, input_size, hidden_size)

    out, h_final = ctrnn_forward(x, w_in, w_h, initial_hidden, alpha)
    out = jax.block_until_ready(out)
    h_final = jax.block_until_ready(h_final)

    # Verify against a pure-JAX reference of the PyTorch semantics.
    ref_out, ref_h = ctrnn_reference(x, w_in, w_h, initial_hidden, alpha)
    assert out.shape == (seq_len, batch, hidden_size)
    assert h_final.shape == (batch, hidden_size)
    assert jnp.allclose(out, ref_out, atol=1e-5, rtol=1e-5)
    assert jnp.allclose(h_final, ref_h, atol=1e-5, rtol=1e-5)

    print("KERNEL_OK")
</pallas_src>

<mosaic_0001>
module attributes {stable_mosaic.version = 11 : i64} {
  func.func @_ctrnn_kernel(%arg0: i32, %arg1: memref<64x4xf32, #tpu.memory_space<vmem>>, %arg2: memref<4x128xf32, #tpu.memory_space<vmem>>, %arg3: memref<128x128xf32, #tpu.memory_space<vmem>>, %arg4: memref<8x128xf32, #tpu.memory_space<vmem>>, %arg5: memref<64x128xf32, #tpu.memory_space<vmem>>, %arg6: memref<8x128xf32, #tpu.memory_space<vmem>>) attributes {dimension_semantics = [#tpu.dimension_semantics<arbitrary>], iteration_bounds = array<i64: 1>, scalar_prefetch = 0 : i64, scratch_operands = 1 : i64, tpu.core_type = #tpu.core_type<tc>, window_params = [{transform_indices = @transform_0, window_bounds = array<i64: 64, 4>}, {pipeline_mode = #tpu.pipeline_mode<synchronous>, transform_indices = @transform_1, window_bounds = array<i64: 4, 128>}, {pipeline_mode = #tpu.pipeline_mode<synchronous>, transform_indices = @transform_2, window_bounds = array<i64: 128, 128>}, {pipeline_mode = #tpu.pipeline_mode<synchronous>, transform_indices = @transform_3, window_bounds = array<i64: 8, 128>}, {transform_indices = @transform_4, window_bounds = array<i64: 64, 128>}]} {
    %c0_i32 = arith.constant 0 : i32
    %0 = arith.cmpi eq, %arg0, %c0_i32 : i32
    %1 = arith.extui %0 : i1 to i32
    %c0_i32_0 = arith.constant 0 : i32
    %2 = arith.cmpi ne, %1, %c0_i32_0 : i32
    scf.if %2 {
      %c0_85 = arith.constant 0 : index
      %c0_86 = arith.constant 0 : index
      %170 = vector.load %arg4[%c0_85, %c0_86] : memref<8x128xf32, #tpu.memory_space<vmem>>, vector<8x128xf32>
      %c0_87 = arith.constant 0 : index
      %c0_88 = arith.constant 0 : index
      %171 = vector.load %arg6[%c0_87, %c0_88] : memref<8x128xf32, #tpu.memory_space<vmem>>, vector<8x128xf32>
      tpu.vector_store %arg6[%c0_87, %c0_88], %170 {strides = array<i32>} : memref<8x128xf32, #tpu.memory_space<vmem>>, vector<8x128xf32>,
    } else {
    }
    %c0 = arith.constant 0 : index
    %c0_1 = arith.constant 0 : index
    %3 = vector.load %arg1[%c0, %c0_1] : memref<64x4xf32, #tpu.memory_space<vmem>>, vector<64x4xf32>
    %c0_2 = arith.constant 0 : index
    %c0_3 = arith.constant 0 : index
    %4 = vector.load %arg2[%c0_2, %c0_3] : memref<4x128xf32, #tpu.memory_space<vmem>>, vector<4x128xf32>
    %cst = arith.constant dense<0.000000e+00> : vector<64x128xf32>
    %5 = tpu.matmul %3, %4, %cst {dimension_numbers = #tpu.dot_dimension_numbers<[1], [0], [0], [1], [0, 0, 1, 1], [], []>} : vector<64x4xf32>, vector<4x128xf32>, vector<64x128xf32> -> vector<64x128xf32>
    %c0_4 = arith.constant 0 : index
    %c0_5 = arith.constant 0 : index
    %6 = vector.load %arg5[%c0_4, %c0_5] : memref<64x128xf32, #tpu.memory_space<vmem>>, vector<64x128xf32>
    tpu.vector_store %arg5[%c0_4, %c0_5], %5 {strides = array<i32>} : memref<64x128xf32, #tpu.memory_space<vmem>>, vector<64x128xf32>,
    %c0_6 = arith.constant 0 : index
    %c0_7 = arith.constant 0 : index
    %7 = vector.load %arg3[%c0_6, %c0_7] : memref<128x128xf32, #tpu.memory_space<vmem>>, vector<128x128xf32>
    %c0_8 = arith.constant 0 : index
    %c0_9 = arith.constant 0 : index
    %8 = vector.load %arg6[%c0_8, %c0_9] : memref<8x128xf32, #tpu.memory_space<vmem>>, vector<8x128xf32>
    %c0_i32_10 = arith.constant 0 : i32
    %c8_i32 = arith.constant 8 : i32
    %9 = arith.muli %c0_i32_10, %c8_i32 : i32
    %10 = tpu.assume_multiple %9, 8 : i32
    %11 = arith.index_cast %10 : i32 to index
    %c0_11 = arith.constant 0 : index
    %12 = vector.load %arg5[%11, %c0_11] : memref<64x128xf32, #tpu.memory_space<vmem>>, vector<8x128xf32>
    %cst_12 = arith.constant dense<0.000000e+00> : vector<8x128xf32>
    %13 = tpu.matmul %8, %7, %cst_12 {dimension_numbers = #tpu.dot_dimension_numbers<[1], [0], [0], [1], [0, 0, 1, 1], [], []>} : vector<8x128xf32>, vector<128x128xf32>, vector<8x128xf32> -> vector<8x128xf32>
    %14 = arith.addf %12, %13 : vector<8x128xf32>
    %cst_13 = arith.constant 5.000000e-01 : f32
    %15 = vector.broadcast %cst_13 : f32 to vector<8x128xf32>
    %16 = arith.mulf %15, %14 : vector<8x128xf32>
    %17 = math.tanh %16 : vector<8x128xf32>
    %cst_14 = arith.constant 5.000000e-01 : f32
    %18 = vector.broadcast %cst_14 : f32 to vector<8x128xf32>
    %19 = arith.mulf %18, %17 : vector<8x128xf32>
    %cst_15 = arith.constant 5.000000e-01 : f32
    %20 = vector.broadcast %cst_15 : f32 to vector<8x128xf32>
    %21 = arith.addf %19, %20 : vector<8x128xf32>
    %cst_16 = arith.constant 9.800000e-01 : f32
    %22 = vector.broadcast %cst_16 : f32 to vector<8x128xf32>
    %23 = arith.mulf %8, %22 : vector<8x128xf32>
    %cst_17 = arith.constant 2.000000e-02 : f32
    %24 = vector.broadcast %cst_17 : f32 to vector<8x128xf32>
    %25 = arith.mulf %21, %24 : vector<8x128xf32>
    %26 = arith.addf %23, %25 : vector<8x128xf32>
    %27 = arith.index_cast %10 : i32 to index
    %c0_18 = arith.constant 0 : index
    %28 = vector.load %arg5[%27, %c0_18] : memref<64x128xf32, #tpu.memory_space<vmem>>, vector<8x128xf32>
    tpu.vector_store %arg5[%27, %c0_18], %26 {strides = array<i32>} : memref<64x128xf32, #tpu.memory_space<vmem>>, vector<8x128xf32>,
    %c1_i32 = arith.constant 1 : i32
    %c8_i32_19 = arith.constant 8 : i32
    %29 = arith.muli %c1_i32, %c8_i32_19 : i32
    %30 = tpu.assume_multiple %29, 8 : i32
    %31 = arith.index_cast %30 : i32 to index
    %c0_20 = arith.constant 0 : index
    %32 = vector.load %arg5[%31, %c0_20] : memref<64x128xf32, #tpu.memory_space<vmem>>, vector<8x128xf32>
    %cst_21 = arith.constant dense<0.000000e+00> : vector<8x128xf32>
    %33 = tpu.matmul %26, %7, %cst_21 {dimension_numbers = #tpu.dot_dimension_numbers<[1], [0], [0], [1], [0, 0, 1, 1], [], []>} : vector<8x128xf32>, vector<128x128xf32>, vector<8x128xf32> -> vector<8x128xf32>
    %34 = arith.addf %32, %33 : vector<8x128xf32>
    %cst_22 = arith.constant 5.000000e-01 : f32
    %35 = vector.broadcast %cst_22 : f32 to vector<8x128xf32>
    %36 = arith.mulf %35, %34 : vector<8x128xf32>
    %37 = math.tanh %36 : vector<8x128xf32>
    %cst_23 = arith.constant 5.000000e-01 : f32
    %38 = vector.broadcast %cst_23 : f32 to vector<8x128xf32>
    %39 = arith.mulf %38, %37 : vector<8x128xf32>
    %cst_24 = arith.constant 5.000000e-01 : f32
    %40 = vector.broadcast %cst_24 : f32 to vector<8x128xf32>
    %41 = arith.addf %39, %40 : vector<8x128xf32>
    %cst_25 = arith.constant 9.800000e-01 : f32
    %42 = vector.broadcast %cst_25 : f32 to vector<8x128xf32>
    %43 = arith.mulf %26, %42 : vector<8x128xf32>
    %cst_26 = arith.constant 2.000000e-02 : f32
    %44 = vector.broadcast %cst_26 : f32 to vector<8x128xf32>
    %45 = arith.mulf %41, %44 : vector<8x128xf32>
    %46 = arith.addf %43, %45 : vector<8x128xf32>
    %47 = arith.index_cast %30 : i32 to index
    %c0_27 = arith.constant 0 : index
    %48 = vector.load %arg5[%47, %c0_27] : memref<64x128xf32, #tpu.memory_space<vmem>>, vector<8x128xf32>
    tpu.vector_store %arg5[%47, %c0_27], %46 {strides = array<i32>} : memref<64x128xf32, #tpu.memory_space<vmem>>, vector<8x128xf32>,
    %c2_i32 = arith.constant 2 : i32
    %c8_i32_28 = arith.constant 8 : i32
    %49 = arith.muli %c2_i32, %c8_i32_28 : i32
    %50 = tpu.assume_multiple %49, 8 : i32
    %51 = arith.index_cast %50 : i32 to index
    %c0_29 = arith.constant 0 : index
    %52 = vector.load %arg5[%51, %c0_29] : memref<64x128xf32, #tpu.memory_space<vmem>>, vector<8x128xf32>
    %cst_30 = arith.constant dense<0.000000e+00> : vector<8x128xf32>
    %53 = tpu.matmul %46, %7, %cst_30 {dimension_numbers = #tpu.dot_dimension_numbers<[1], [0], [0], [1], [0, 0, 1, 1], [], []>} : vector<8x128xf32>, vector<128x128xf32>, vector<8x128xf32> -> vector<8x128xf32>
    %54 = arith.addf %52, %53 : vector<8x128xf32>
    %cst_31 = arith.constant 5.000000e-01 : f32
    %55 = vector.broadcast %cst_31 : f32 to vector<8x128xf32>
    %56 = arith.mulf %55, %54 : vector<8x128xf32>
    %57 = math.tanh %56 : vector<8x128xf32>
    %cst_32 = arith.constant 5.000000e-01 : f32
    %58 = vector.broadcast %cst_32 : f32 to vector<8x128xf32>
    %59 = arith.mulf %58, %57 : vector<8x128xf32>
    %cst_33 = arith.constant 5.000000e-01 : f32
    %60 = vector.broadcast %cst_33 : f32 to vector<8x128xf32>
    %61 = arith.addf %59, %60 : vector<8x128xf32>
    %cst_34 = arith.constant 9.800000e-01 : f32
    %62 = vector.broadcast %cst_34 : f32 to vector<8x128xf32>
    %63 = arith.mulf %46, %62 : vector<8x128xf32>
    %cst_35 = arith.constant 2.000000e-02 : f32
    %64 = vector.broadcast %cst_35 : f32 to vector<8x128xf32>
    %65 = arith.mulf %61, %64 : vector<8x128xf32>
    %66 = arith.addf %63, %65 : vector<8x128xf32>
    %67 = arith.index_cast %50 : i32 to index
    %c0_36 = arith.constant 0 : index
    %68 = vector.load %arg5[%67, %c0_36] : memref<64x128xf32, #tpu.memory_space<vmem>>, vector<8x128xf32>
    tpu.vector_store %arg5[%67, %c0_36], %66 {strides = array<i32>} : memref<64x128xf32, #tpu.memory_space<vmem>>, vector<8x128xf32>,
    %c3_i32 = arith.constant 3 : i32
    %c8_i32_37 = arith.constant 8 : i32
    %69 = arith.muli %c3_i32, %c8_i32_37 : i32
    %70 = tpu.assume_multiple %69, 8 : i32
    %71 = arith.index_cast %70 : i32 to index
    %c0_38 = arith.constant 0 : index
    %72 = vector.load %arg5[%71, %c0_38] : memref<64x128xf32, #tpu.memory_space<vmem>>, vector<8x128xf32>
    %cst_39 = arith.constant dense<0.000000e+00> : vector<8x128xf32>
    %73 = tpu.matmul %66, %7, %cst_39 {dimension_numbers = #tpu.dot_dimension_numbers<[1], [0], [0], [1], [0, 0, 1, 1], [], []>} : vector<8x128xf32>, vector<128x128xf32>, vector<8x128xf32> -> vector<8x128xf32>
    %74 = arith.addf %72, %73 : vector<8x128xf32>
    %cst_40 = arith.constant 5.000000e-01 : f32
    %75 = vector.broadcast %cst_40 : f32 to vector<8x128xf32>
    %76 = arith.mulf %75, %74 : vector<8x128xf32>
    %77 = math.tanh %76 : vector<8x128xf32>
    %cst_41 = arith.constant 5.000000e-01 : f32
    %78 = vector.broadcast %cst_41 : f32 to vector<8x128xf32>
    %79 = arith.mulf %78, %77 : vector<8x128xf32>
    %cst_42 = arith.constant 5.000000e-01 : f32
    %80 = vector.broadcast %cst_42 : f32 to vector<8x128xf32>
    %81 = arith.addf %79, %80 : vector<8x128xf32>
    %cst_43 = arith.constant 9.800000e-01 : f32
    %82 = vector.broadcast %cst_43 : f32 to vector<8x128xf32>
    %83 = arith.mulf %66, %82 : vector<8x128xf32>
    %cst_44 = arith.constant 2.000000e-02 : f32
    %84 = vector.broadcast %cst_44 : f32 to vector<8x128xf32>
    %85 = arith.mulf %81, %84 : vector<8x128xf32>
    %86 = arith.addf %83, %85 : vector<8x128xf32>
    %87 = arith.index_cast %70 : i32 to index
    %c0_45 = arith.constant 0 : index
    %88 = vector.load %arg5[%87, %c0_45] : memref<64x128xf32, #tpu.memory_space<vmem>>, vector<8x128xf32>
    tpu.vector_store %arg5[%87, %c0_45], %86 {strides = array<i32>} : memref<64x128xf32, #tpu.memory_space<vmem>>, vector<8x128xf32>,
    %c4_i32 = arith.constant 4 : i32
    %c8_i32_46 = arith.constant 8 : i32
    %89 = arith.muli %c4_i32, %c8_i32_46 : i32
    %90 = tpu.assume_multiple %89, 8 : i32
    %91 = arith.index_cast %90 : i32 to index
    %c0_47 = arith.constant 0 : index
    %92 = vector.load %arg5[%91, %c0_47] : memref<64x128xf32, #tpu.memory_space<vmem>>, vector<8x128xf32>
    %cst_48 = arith.constant dense<0.000000e+00> : vector<8x128xf32>
    %93 = tpu.matmul %86, %7, %cst_48 {dimension_numbers = #tpu.dot_dimension_numbers<[1], [0], [0], [1], [0, 0, 1, 1], [], []>} : vector<8x128xf32>, vector<128x128xf32>, vector<8x128xf32> -> vector<8x128xf32>
    %94 = arith.addf %92, %93 : vector<8x128xf32>
    %cst_49 = arith.constant 5.000000e-01 : f32
    %95 = vector.broadcast %cst_49 : f32 to vector<8x128xf32>
    %96 = arith.mulf %95, %94 : vector<8x128xf32>
    %97 = math.tanh %96 : vector<8x128xf32>
    %cst_50 = arith.constant 5.000000e-01 : f32
    %98 = vector.broadcast %cst_50 : f32 to vector<8x128xf32>
    %99 = arith.mulf %98, %97 : vector<8x128xf32>
    %cst_51 = arith.constant 5.000000e-01 : f32
    %100 = vector.broadcast %cst_51 : f32 to vector<8x128xf32>
    %101 = arith.addf %99, %100 : vector<8x128xf32>
    %cst_52 = arith.constant 9.800000e-01 : f32
    %102 = vector.broadcast %cst_52 : f32 to vector<8x128xf32>
    %103 = arith.mulf %86, %102 : vector<8x128xf32>
    %cst_53 = arith.constant 2.000000e-02 : f32
    %104 = vector.broadcast %cst_53 : f32 to vector<8x128xf32>
    %105 = arith.mulf %101, %104 : vector<8x128xf32>
    %106 = arith.addf %103, %105 : vector<8x128xf32>
    %107 = arith.index_cast %90 : i32 to index
    %c0_54 = arith.constant 0 : index
    %108 = vector.load %arg5[%107, %c0_54] : memref<64x128xf32, #tpu.memory_space<vmem>>, vector<8x128xf32>
    tpu.vector_store %arg5[%107, %c0_54], %106 {strides = array<i32>} : memref<64x128xf32, #tpu.memory_space<vmem>>, vector<8x128xf32>,
    %c5_i32 = arith.constant 5 : i32
    %c8_i32_55 = arith.constant 8 : i32
    %109 = arith.muli %c5_i32, %c8_i32_55 : i32
    %110 = tpu.assume_multiple %109, 8 : i32
    %111 = arith.index_cast %110 : i32 to index
    %c0_56 = arith.constant 0 : index
    %112 = vector.load %arg5[%111, %c0_56] : memref<64x128xf32, #tpu.memory_space<vmem>>, vector<8x128xf32>
    %cst_57 = arith.constant dense<0.000000e+00> : vector<8x128xf32>
    %113 = tpu.matmul %106, %7, %cst_57 {dimension_numbers = #tpu.dot_dimension_numbers<[1], [0], [0], [1], [0, 0, 1, 1], [], []>} : vector<8x128xf32>, vector<128x128xf32>, vector<8x128xf32> -> vector<8x128xf32>
    %114 = arith.addf %112, %113 : vector<8x128xf32>
    %cst_58 = arith.constant 5.000000e-01 : f32
    %115 = vector.broadcast %cst_58 : f32 to vector<8x128xf32>
    %116 = arith.mulf %115, %114 : vector<8x128xf32>
    %117 = math.tanh %116 : vector<8x128xf32>
    %cst_59 = arith.constant 5.000000e-01 : f32
    %118 = vector.broadcast %cst_59 : f32 to vector<8x128xf32>
    %119 = arith.mulf %118, %117 : vector<8x128xf32>
    %cst_60 = arith.constant 5.000000e-01 : f32
    %120 = vector.broadcast %cst_60 : f32 to vector<8x128xf32>
    %121 = arith.addf %119, %120 : vector<8x128xf32>
    %cst_61 = arith.constant 9.800000e-01 : f32
    %122 = vector.broadcast %cst_61 : f32 to vector<8x128xf32>
    %123 = arith.mulf %106, %122 : vector<8x128xf32>
    %cst_62 = arith.constant 2.000000e-02 : f32
    %124 = vector.broadcast %cst_62 : f32 to vector<8x128xf32>
    %125 = arith.mulf %121, %124 : vector<8x128xf32>
    %126 = arith.addf %123, %125 : vector<8x128xf32>
    %127 = arith.index_cast %110 : i32 to index
    %c0_63 = arith.constant 0 : index
    %128 = vector.load %arg5[%127, %c0_63] : memref<64x128xf32, #tpu.memory_space<vmem>>, vector<8x128xf32>
    tpu.vector_store %arg5[%127, %c0_63], %126 {strides = array<i32>} : memref<64x128xf32, #tpu.memory_space<vmem>>, vector<8x128xf32>,
    %c6_i32 = arith.constant 6 : i32
    %c8_i32_64 = arith.constant 8 : i32
    %129 = arith.muli %c6_i32, %c8_i32_64 : i32
    %130 = tpu.assume_multiple %129, 8 : i32
    %131 = arith.index_cast %130 : i32 to index
    %c0_65 = arith.constant 0 : index
    %132 = vector.load %arg5[%131, %c0_65] : memref<64x128xf32, #tpu.memory_space<vmem>>, vector<8x128xf32>
    %cst_66 = arith.constant dense<0.000000e+00> : vector<8x128xf32>
    %133 = tpu.matmul %126, %7, %cst_66 {dimension_numbers = #tpu.dot_dimension_numbers<[1], [0], [0], [1], [0, 0, 1, 1], [], []>} : vector<8x128xf32>, vector<128x128xf32>, vector<8x128xf32> -> vector<8x128xf32>
    %134 = arith.addf %132, %133 : vector<8x128xf32>
    %cst_67 = arith.constant 5.000000e-01 : f32
    %135 = vector.broadcast %cst_67 : f32 to vector<8x128xf32>
    %136 = arith.mulf %135, %134 : vector<8x128xf32>
    %137 = math.tanh %136 : vector<8x128xf32>
    %cst_68 = arith.constant 5.000000e-01 : f32
    %138 = vector.broadcast %cst_68 : f32 to vector<8x128xf32>
    %139 = arith.mulf %138, %137 : vector<8x128xf32>
    %cst_69 = arith.constant 5.000000e-01 : f32
    %140 = vector.broadcast %cst_69 : f32 to vector<8x128xf32>
    %141 = arith.addf %139, %140 : vector<8x128xf32>
    %cst_70 = arith.constant 9.800000e-01 : f32
    %142 = vector.broadcast %cst_70 : f32 to vector<8x128xf32>
    %143 = arith.mulf %126, %142 : vector<8x128xf32>
    %cst_71 = arith.constant 2.000000e-02 : f32
    %144 = vector.broadcast %cst_71 : f32 to vector<8x128xf32>
    %145 = arith.mulf %141, %144 : vector<8x128xf32>
    %146 = arith.addf %143, %145 : vector<8x128xf32>
    %147 = arith.index_cast %130 : i32 to index
    %c0_72 = arith.constant 0 : index
    %148 = vector.load %arg5[%147, %c0_72] : memref<64x128xf32, #tpu.memory_space<vmem>>, vector<8x128xf32>
    tpu.vector_store %arg5[%147, %c0_72], %146 {strides = array<i32>} : memref<64x128xf32, #tpu.memory_space<vmem>>, vector<8x128xf32>,
    %c7_i32 = arith.constant 7 : i32
    %c8_i32_73 = arith.constant 8 : i32
    %149 = arith.muli %c7_i32, %c8_i32_73 : i32
    %150 = tpu.assume_multiple %149, 8 : i32
    %151 = arith.index_cast %150 : i32 to index
    %c0_74 = arith.constant 0 : index
    %152 = vector.load %arg5[%151, %c0_74] : memref<64x128xf32, #tpu.memory_space<vmem>>, vector<8x128xf32>
    %cst_75 = arith.constant dense<0.000000e+00> : vector<8x128xf32>
    %153 = tpu.matmul %146, %7, %cst_75 {dimension_numbers = #tpu.dot_dimension_numbers<[1], [0], [0], [1], [0, 0, 1, 1], [], []>} : vector<8x128xf32>, vector<128x128xf32>, vector<8x128xf32> -> vector<8x128xf32>
    %154 = arith.addf %152, %153 : vector<8x128xf32>
    %cst_76 = arith.constant 5.000000e-01 : f32
    %155 = vector.broadcast %cst_76 : f32 to vector<8x128xf32>
    %156 = arith.mulf %155, %154 : vector<8x128xf32>
    %157 = math.tanh %156 : vector<8x128xf32>
    %cst_77 = arith.constant 5.000000e-01 : f32
    %158 = vector.broadcast %cst_77 : f32 to vector<8x128xf32>
    %159 = arith.mulf %158, %157 : vector<8x128xf32>
    %cst_78 = arith.constant 5.000000e-01 : f32
    %160 = vector.broadcast %cst_78 : f32 to vector<8x128xf32>
    %161 = arith.addf %159, %160 : vector<8x128xf32>
    %cst_79 = arith.constant 9.800000e-01 : f32
    %162 = vector.broadcast %cst_79 : f32 to vector<8x128xf32>
    %163 = arith.mulf %146, %162 : vector<8x128xf32>
    %cst_80 = arith.constant 2.000000e-02 : f32
    %164 = vector.broadcast %cst_80 : f32 to vector<8x128xf32>
    %165 = arith.mulf %161, %164 : vector<8x128xf32>
    %166 = arith.addf %163, %165 : vector<8x128xf32>
    %167 = arith.index_cast %150 : i32 to index
    %c0_81 = arith.constant 0 : index
    %168 = vector.load %arg5[%167, %c0_81] : memref<64x128xf32, #tpu.memory_space<vmem>>, vector<8x128xf32>
    tpu.vector_store %arg5[%167, %c0_81], %166 {strides = array<i32>} : memref<64x128xf32, #tpu.memory_space<vmem>>, vector<8x128xf32>,
    %c8_i32_82 = arith.constant 8 : i32
    %c0_83 = arith.constant 0 : index
    %c0_84 = arith.constant 0 : index
    %169 = vector.load %arg6[%c0_83, %c0_84] : memref<8x128xf32, #tpu.memory_space<vmem>>, vector<8x128xf32>
    tpu.vector_store %arg6[%c0_83, %c0_84], %166 {strides = array<i32>} : memref<8x128xf32, #tpu.memory_space<vmem>>, vector<8x128xf32>,
    return
  }
  func.func @transform_0(%arg0: i32) -> (i32, i32) {
    %c0_i32 = arith.constant 0 : i32
    %c0_i32_0 = arith.constant 0 : i32
    return %arg0, %c0_i32 : i32, i32
  }
  func.func @transform_1(%arg0: i32) -> (i32, i32) {
    %c0_i32 = arith.constant 0 : i32
    %c0_i32_0 = arith.constant 0 : i32
    %c0_i32_1 = arith.constant 0 : i32
    return %c0_i32, %c0_i32_0 : i32, i32
  }
  func.func @transform_2(%arg0: i32) -> (i32, i32) {
    %c0_i32 = arith.constant 0 : i32
    %c0_i32_0 = arith.constant 0 : i32
    %c0_i32_1 = arith.constant 0 : i32
    return %c0_i32, %c0_i32_0 : i32, i32
  }
  func.func @transform_3(%arg0: i32) -> (i32, i32) {
    %c0_i32 = arith.constant 0 : i32
    %c0_i32_0 = arith.constant 0 : i32
    %c0_i32_1 = arith.constant 0 : i32
    return %c0_i32, %c0_i32_0 : i32, i32
  }
  func.func @transform_4(%arg0: i32) -> (i32, i32) {
    %c0_i32 = arith.constant 0 : i32
    %c0_i32_0 = arith.constant 0 : i32
    return %arg0, %c0_i32 : i32, i32
  }
}

</mosaic_0001>

<bundles_post_ra>
// kernel: tpu_custom_call.1
= control target key start
LH: loop header
LB: loop body
LE: loop exit
PB: predicated region body
PF: predicated region fallthrough
CT: control target
= control target key end

     0   :  { %9 = vsyncpa [#allocation4], 0  ;;  %s1789_s0 = inlined_call_operand.vmem [shape: f32[64,4], index: 0, kind: input, shape index: {}]   ;;  %s1790_s1 = inlined_call_operand.vmem [shape: f32[4,128], index: 1, kind: input, shape index: {}]   ;;  %s1791_s2 = inlined_call_operand.hbm [shape: f32[128,128], index: 2, kind: input, shape index: {}]   ;;  %s1792_s3 = inlined_call_operand.vmem [shape: f32[8,128], index: 3, kind: input, shape index: {}]   ;;  %s1793_s4 = inlined_call_operand.hbm [shape: f32[64,128], index: 4, kind: output, shape index: {}]  }
   0x1   :  { %10 = vsyncpa [#allocation5], 0  ;;  %s1385_s15 = smov [#allocation3]  }
   0x2   :  { %s20_s16 = sshll.u32 %s1385_s15, 4  ;;  %s21_s16 = int_to_ptr.vmem [resolvable:$true] %s20_s16 }
   0x3   :  { %s1349_s17 = scalar_lea.vmem %s21_s16, 2048  ;;  %p1354_p1 = scmp.lt.s32.totalorder %s21_s16, %s21_s16 }
   0x4   :  { %p1350_p0 = scmp.ne.s32.totalorder %s21_s16, %s1349_s17  ;;  %p1355_p2 = scmp.lt.s32.totalorder %s1349_s17, %s1349_s17 }
   0x6   :  { %p1356_p3 = por %p1355_p2, %p1354_p1 }
   0x8   :  { %p1357_p4 = pnand %p1356_p3, %p1350_p0 }
   0xa   :  { %1360 = shalt.err (!%p1357_p4)
}
   0xb   :  { %s1386_s18 = smov 128   ;;  %s1387_s19 = smov 8  }
   0xc   :  { %26 = dma.hbm_to_vmem [thread:$0]  %s1791_s2, 2048, %s21_s16, [#allocation4], %s1386_s18, %s1386_s18, %s1387_s19  }
   0xd   :  { %1381 = dma.done.wait [#allocation4], 2048  }
   0xe   :  { %1382 = vsyncadd [#allocation4], 4294965248  ;;  %v1388_v0 = vmov 0.0   ;;  %vm1389_vm0 = vmmov 0   ;;  %v1425_v1 = vld [vmem:[#allocation3 + $0x78] sm:$0xff]  ;;  %v1427_v2 = vld [vmem:[#allocation3 + $0x70] sm:$0xff] }
   0xf   :  { %1039 = vmatprep.subr.mxu1 %v1388_v0  ;;  %1071 = vmatprep.mubr.msk.f32.mxu1 %vm1389_vm0, %v1388_v0  ;;  %vm72_vm1 = vcmask 1043456   ;;  %v1431_v3 = vld [vmem:[#allocation3 + $0x68] sm:$0xff]  ;;  %v46_v4 = vld [vmem:[%s1790_s1] sm:$0xf]  ;;  %vm47_vm2 = vcmask 31744   ;;  %v1448_v8 = vld [vmem:[#allocation3 + $0x58] sm:$0xff] }
  0x10   :  { %1040 = vmatpush3.msra.mxu1 %v1425_v1  ;;  %v38_v5 = vld [vmem:[%s1789_s0] sm:$0xff]  ;;  %1025 = vmatprep.subr.msk.mxu0 %vm72_vm1, %v46_v4  ;;  %v39_v7 = vld [vmem:[%s1789_s0 + $0x8] sm:$0xff]  ;;  %v1454_v9 = vld [vmem:[#allocation3 + $0x50] sm:$0xff] }
  0x11   :  { %1041 = vmatprep.subr.mxu1 %v1388_v0  ;;  %v1441_v6 = vld [vmem:[#allocation3 + $0x60] sm:$0xff]  ;;  %1026 = vmatpush3.msk.msra.mxu0 %vm72_vm1, %v46_v4  ;;  %v1460_v10 = vld [vmem:[#allocation3 + $0x48] sm:$0xff]  ;;  %v1472_v12 = vld [vmem:[#allocation3 + $0x38] sm:$0xff] }
  0x12   :  { %1042 = vmatpush3.msra.mxu1 %v1427_v2  ;;  %1027 = vmatprep.mubr.msk.f32.mxu0 %vm47_vm2, %v38_v5  ;;  %v1466_v11 = vld [vmem:[#allocation3 + $0x40] sm:$0xff]  ;;  %v1478_v13 = vld [vmem:[#allocation3 + $0x30] sm:$0xff]  ;;  %v1484_v14 = vld [vmem:[#allocation3 + $0x28] sm:$0xff] }
  0x13   :  { %1043 = vmatprep.subr.mxu1 %v1388_v0  ;;  %1028 = vmatmul.mubr.msk.f32.vlgmr.msra.gmra.mxu0 %vm47_vm2, %v39_v7  ;;  %v1490_v15 = vld [vmem:[#allocation3 + $0x20] sm:$0xff]  ;;  %v1496_v16 = vld [vmem:[#allocation3 + $0x18] sm:$0xff]  ;;  %v1502_v17 = vld [vmem:[#allocation3 + $0x10] sm:$0xff] }
  0x14   :  { %1044 = vmatpush3.msra.mxu1 %v1431_v3  ;;  %1074 = vmatprep.subr.mxu0 %v1388_v0  ;;  %v1508_v18 = vld [vmem:[#allocation3 + $0x8] sm:$0xff]  ;;  %v1514_v19 = vld [vmem:[#allocation3] sm:$0xff]  ;;  %v40_v21 = vld [vmem:[%s1789_s0 + $0x10] sm:$0xff] }
  0x15   :  { %1045 = vmatprep.subr.mxu1 %v1388_v0  ;;  %1075 = vmatpush3.msra.mxu0 %v1425_v1  ;;  %v1521_v20 = vld [vmem:[%s1792_s3] sm:$0xff]  ;;  %v41_v22 = vld [vmem:[%s1789_s0 + $0x18] sm:$0xff]  ;;  %v43_v24 = vld [vmem:[%s1789_s0 + $0x28] sm:$0xff] }
  0x16   :  { %1046 = vmatpush3.msra.mxu1 %v1441_v6  ;;  %1076 = vmatprep.subr.mxu0 %v1388_v0  ;;  %v42_v23 = vld [vmem:[%s1789_s0 + $0x20] sm:$0xff]  ;;  %v44_v25 = vld [vmem:[%s1789_s0 + $0x30] sm:$0xff]  ;;  %v45_v26 = vld [vmem:[%s1789_s0 + $0x38] sm:$0xff]  ;;  %v282_v35 = vmul.f32 0.98, %v1521_v20  ;;  %s1390_s0 = smov [#allocation6]  }
  0x17   :  { %1047 = vmatprep.subr.mxu1 %v1388_v0  ;;  %1077 = vmatpush3.msra.mxu0 %v1427_v2  ;;  %s859_s13 = sshll.u32 %s1390_s0, 4  ;;  %s860_s13 = int_to_ptr.vmem [resolvable:$true] %s859_s13 }
  0x18   :  { %1048 = vmatpush3.msra.mxu1 %v1448_v8  ;;  %1078 = vmatprep.subr.mxu0 %v1388_v0  ;;  %s1361_s14 = scalar_lea.vmem %s860_s13, 1024  ;;  %p1366_p6 = scmp.lt.s32.totalorder %s860_s13, %s860_s13 }
  0x19   :  { %1049 = vmatprep.subr.mxu1 %v1388_v0  ;;  %1079 = vmatpush3.msra.mxu0 %v1431_v3  ;;  %p1362_p5 = scmp.ne.s32.totalorder %s860_s13, %s1361_s14  ;;  %p1367_p7 = scmp.lt.s32.totalorder %s1361_s14, %s1361_s14 }
  0x1a   :  { %1050 = vmatpush3.msra.mxu1 %v1454_v9  ;;  %1080 = vmatprep.subr.mxu0 %v1388_v0 }
  0x1b   :  { %1051 = vmatprep.subr.mxu1 %v1388_v0  ;;  %1081 = vmatpush3.msra.mxu0 %v1441_v6  ;;  %p1368_p8 = por %p1367_p7, %p1366_p6 }
  0x1c   :  { %1052 = vmatpush3.msra.mxu1 %v1460_v10  ;;  %1082 = vmatprep.subr.mxu0 %v1388_v0 }
  0x1d   :  { %1053 = vmatprep.subr.mxu1 %v1388_v0  ;;  %1083 = vmatpush3.msra.mxu0 %v1448_v8  ;;  %p1369_p9 = pnand %p1368_p8, %p1362_p5 }
  0x1e   :  { %1054 = vmatpush3.msra.mxu1 %v1466_v11  ;;  %1084 = vmatprep.subr.mxu0 %v1388_v0 }
  0x1f   :  { %1055 = vmatprep.subr.mxu1 %v1388_v0  ;;  %1085 = vmatpush3.msra.mxu0 %v1454_v9 }
  0x20   :  { %1056 = vmatpush3.msra.mxu1 %v1472_v12  ;;  %1086 = vmatprep.subr.mxu0 %v1388_v0 }
  0x21   :  { %1057 = vmatprep.subr.mxu1 %v1388_v0  ;;  %1087 = vmatpush3.msra.mxu0 %v1460_v10 }
  0x22   :  { %1058 = vmatpush3.msra.mxu1 %v1478_v13  ;;  %1088 = vmatprep.subr.mxu0 %v1388_v0 }
  0x23   :  { %1059 = vmatprep.subr.mxu1 %v1388_v0  ;;  %1089 = vmatpush3.msra.mxu0 %v1466_v11 }
  0x24   :  { %1060 = vmatpush3.msra.mxu1 %v1484_v14  ;;  %1090 = vmatprep.subr.mxu0 %v1388_v0 }
  0x25   :  { %1061 = vmatprep.subr.mxu1 %v1388_v0  ;;  %1091 = vmatpush3.msra.mxu0 %v1472_v12 }
  0x26   :  { %1062 = vmatpush3.msra.mxu1 %v1490_v15  ;;  %1092 = vmatprep.subr.mxu0 %v1388_v0 }
  0x27   :  { %1063 = vmatprep.subr.mxu1 %v1388_v0  ;;  %1093 = vmatpush3.msra.mxu0 %v1478_v13 }
  0x28   :  { %1064 = vmatpush3.msra.mxu1 %v1496_v16  ;;  %1094 = vmatprep.subr.mxu0 %v1388_v0 }
  0x29   :  { %1065 = vmatprep.subr.mxu1 %v1388_v0  ;;  %1095 = vmatpush3.msra.mxu0 %v1484_v14 }
  0x2a   :  { %1066 = vmatpush3.msra.mxu1 %v1502_v17  ;;  %1096 = vmatprep.subr.mxu0 %v1388_v0 }
  0x2b   :  { %1067 = vmatprep.subr.mxu1 %v1388_v0  ;;  %1097 = vmatpush3.msra.mxu0 %v1490_v15 }
  0x2c   :  { %1068 = vmatpush3.msra.mxu1 %v1508_v18  ;;  %1098 = vmatprep.subr.mxu0 %v1388_v0 }
  0x2d   :  { %1069 = vmatprep.subr.mxu1 %v1388_v0  ;;  %1099 = vmatpush3.msra.mxu0 %v1496_v16 }
  0x2e   :  { %1070 = vmatpush3.msra.mxu1 %v1514_v19  ;;  %1100 = vmatprep.subr.mxu0 %v1388_v0 }
  0x2f   :  { %1072 = vmatmul.mubr.f32.vlgmr.msra.gmra.mxu1 %v1521_v20  ;;  %1109 = vmatprep.subr.mxu1 %v1388_v0 }
  0x30   :  { %1110 = vmatpush3.msra.mxu1 %v1425_v1  ;;  %1101 = vmatpush3.msra.mxu0 %v1502_v17 }
  0x31   :  { %1111 = vmatprep.subr.mxu1 %v1388_v0  ;;  %1102 = vmatprep.subr.mxu0 %v1388_v0 }
  0x32   :  { %1112 = vmatpush3.msra.mxu1 %v1427_v2  ;;  %1103 = vmatpush3.msra.mxu0 %v1508_v18 }
  0x33   :  { %1113 = vmatprep.subr.mxu1 %v1388_v0  ;;  %1104 = vmatprep.subr.mxu0 %v1388_v0 }
  0x34   :  { %1114 = vmatpush3.msra.mxu1 %v1431_v3  ;;  %1105 = vmatpush3.msra.mxu0 %v1514_v19 }
  0x35   :  { %1115 = vmatprep.subr.mxu1 %v1388_v0  ;;  %1141 = vmatprep.mubr.msk.f32.mxu1 %vm1389_vm0, %v1388_v0 }
  0x36   :  { %1116 = vmatpush3.msra.mxu1 %v1441_v6  ;;  %1144 = vmatprep.subr.mxu0 %v1388_v0 }
  0x37   :  { %1117 = vmatprep.subr.mxu1 %v1388_v0  ;;  %1030 = vmatprep.mubr.msk.f32.mxu0 %vm47_vm2, %v40_v21 }
  0x38   :  { %1118 = vmatpush3.msra.mxu1 %v1448_v8  ;;  %1031 = vmatmul.mubr.msk.f32.gmra.mxu0 %vm47_vm2, %v41_v22 }
  0x39   :  { %1119 = vmatprep.subr.mxu1 %v1388_v0  ;;  %1033 = vmatprep.mubr.msk.f32.mxu0 %vm47_vm2, %v42_v23 }
  0x3a   :  { %1120 = vmatpush3.msra.mxu1 %v1454_v9 }
  0x3b   :  { %1121 = vmatprep.subr.mxu1 %v1388_v0 }
  0x3c   :  { %1122 = vmatpush3.msra.mxu1 %v1460_v10  ;;  %1034 = vmatmul.mubr.msk.f32.gmra.mxu0 %vm47_vm2, %v43_v24 }
  0x3d   :  { %1123 = vmatprep.subr.mxu1 %v1388_v0  ;;  %1036 = vmatprep.mubr.msk.f32.mxu0 %vm47_vm2, %v44_v25 }
  0x3e   :  { %1124 = vmatpush3.msra.mxu1 %v1466_v11 }
  0x3f   :  { %1125 = vmatprep.subr.mxu1 %v1388_v0 }
  0x40   :  { %1126 = vmatpush3.msra.mxu1 %v1472_v12  ;;  %1037 = vmatmul.mubr.msk.f32.gmra.mxu0 %vm47_vm2, %v45_v26 }
  0x41   :  { %1127 = vmatprep.subr.mxu1 %v1388_v0  ;;  %1106 = vmatprep.mubr.msk.f32.mxu0 %vm1389_vm0, %v1388_v0 }
  0x42   :  { %1128 = vmatpush3.msra.mxu1 %v1478_v13 }
  0x43   :  { %1129 = vmatprep.subr.mxu1 %v1388_v0 }
  0x44   :  { %1130 = vmatpush3.msra.mxu1 %v1484_v14 }
  0x45   :  { %1131 = vmatprep.subr.mxu1 %v1388_v0 }
  0x46   :  { %1132 = vmatpush3.msra.mxu1 %v1490_v15 }
  0x47   :  { %1133 = vmatprep.subr.mxu1 %v1388_v0 }
  0x48   :  { %1134 = vmatpush3.msra.mxu1 %v1496_v16 }
  0x49   :  { %1135 = vmatprep.subr.mxu1 %v1388_v0 }
  0x4a   :  { %1136 = vmatpush3.msra.mxu1 %v1502_v17 }
  0x4b   :  { %1137 = vmatprep.subr.mxu1 %v1388_v0 }
  0x4c   :  { %1138 = vmatpush3.msra.mxu1 %v1508_v18 }
  0x4d   :  { %1139 = vmatprep.subr.mxu1 %v1388_v0 }
  0x4e   :  { %1140 = vmatpush3.msra.mxu1 %v1514_v19 }
  0x4f   :  { %1179 = vmatprep.subr.mxu1 %v1388_v0 }
  0xd3   :  { %v1029_v27 = vpop.f32.mrf.mxu0 }
  0xd5   :  { %v142_v28 = vpop.f32.mrf.mxu0 }
  0xef   :  { %v273_v29 = vpop.f32.mrf.mxu1 }
  0xf0   :  { %v277_v30 = vadd.f32 %v273_v29, %v142_v28 }
  0xf1   :  { %v1073_v31 = vpop.f32.mrf.mxu1 }
  0xf2   :  { %v278_v32 = vmul.f32 0.5, %v277_v30 }
  0xf4   :  { %1325 = vtanh.f32 %v278_v32 }
  0xf8   :  { %v1634_v39 = vpop.f32.mrf.mxu0 }
  0xfa   :  { %v152_v40 = vpop.f32.mrf.mxu0 }
  0xfc   :  { %v1636_v41 = vpop.f32.mrf.mxu0 }
  0xfe   :  { %v1638_v42 = vpop.f32.mrf.mxu0 }
 0x100   :  { %v1640_v43 = vpop.f32.mrf.mxu0 }
 0x101   :  { %v1326_v33 = vpop.eup %1325 }
 0x102   :  { %v280_v34 = vmul.f32 0.5, %v1326_v33  ;;  %v1642_v44 = vpop.f32.mrf.mxu0 }
 0x104   :  { %v281_v36 = vadd.f32 0.5, %v280_v34 }
 0x106   :  { %v283_v37 = vmul.f32 0.02, %v281_v36 }
 0x108   :  { %v284_v38 = vadd.f32 %v283_v37, %v282_v35 }
 0x10a   :  { %285 = vst [vmem:[#allocation6] sm:$0xff] %v284_v38  ;;  %1107 = vmatmul.mubr.f32.vlgmr.msra.gmra.mxu0 %v284_v38  ;;  %v363_v52 = vmul.f32 0.98, %v284_v38 }
 0x10b   :  { %1145 = vmatpush3.msra.mxu0 %v1425_v1  ;;  %1176 = vmatprep.mubr.msk.f32.mxu0 %vm1389_vm0, %v1388_v0 }
 0x10c   :  { %1146 = vmatprep.subr.mxu0 %v1388_v0 }
 0x10d   :  { %1147 = vmatpush3.msra.mxu0 %v1427_v2 }
 0x10e   :  { %1148 = vmatprep.subr.mxu0 %v1388_v0 }
 0x10f   :  { %1149 = vmatpush3.msra.mxu0 %v1431_v3 }
 0x110   :  { %1150 = vmatprep.subr.mxu0 %v1388_v0 }
 0x111   :  { %1151 = vmatpush3.msra.mxu0 %v1441_v6 }
 0x112   :  { %1152 = vmatprep.subr.mxu0 %v1388_v0 }
 0x113   :  { %1153 = vmatpush3.msra.mxu0 %v1448_v8 }
 0x114   :  { %1154 = vmatprep.subr.mxu0 %v1388_v0 }
 0x115   :  { %1155 = vmatpush3.msra.mxu0 %v1454_v9 }
 0x116   :  { %1156 = vmatprep.subr.mxu0 %v1388_v0 }
 0x117   :  { %1157 = vmatpush3.msra.mxu0 %v1460_v10 }
 0x118   :  { %1158 = vmatprep.subr.mxu0 %v1388_v0 }
 0x119   :  { %1159 = vmatpush3.msra.mxu0 %v1466_v11 }
 0x11a   :  { %1160 = vmatprep.subr.mxu0 %v1388_v0 }
 0x11b   :  { %1161 = vmatpush3.msra.mxu0 %v1472_v12 }
 0x11c   :  { %1162 = vmatprep.subr.mxu0 %v1388_v0 }
 0x11d   :  { %1163 = vmatpush3.msra.mxu0 %v1478_v13 }
 0x11e   :  { %1164 = vmatprep.subr.mxu0 %v1388_v0 }
 0x11f   :  { %1165 = vmatpush3.msra.mxu0 %v1484_v14 }
 0x120   :  { %1166 = vmatprep.subr.mxu0 %v1388_v0 }
 0x121   :  { %1167 = vmatpush3.msra.mxu0 %v1490_v15 }
 0x122   :  { %1168 = vmatprep.subr.mxu0 %v1388_v0 }
 0x123   :  { %1169 = vmatpush3.msra.mxu0 %v1496_v16 }
 0x124   :  { %1170 = vmatprep.subr.mxu0 %v1388_v0 }
 0x125   :  { %1171 = vmatpush3.msra.mxu0 %v1502_v17 }
 0x126   :  { %1172 = vmatprep.subr.mxu0 %v1388_v0 }
 0x127   :  { %1173 = vmatpush3.msra.mxu0 %v1508_v18 }
 0x128   :  { %1174 = vmatprep.subr.mxu0 %v1388_v0 }
 0x129   :  { %1175 = vmatpush3.msra.mxu0 %v1514_v19 }
 0x12a   :  { %1214 = vmatprep.subr.mxu0 %v1388_v0 }
 0x1ca   :  { %v354_v45 = vpop.f32.mrf.mxu0 }
 0x1cb   :  { %v358_v46 = vadd.f32 %v1029_v27, %v354_v45 }
 0x1cc   :  { %v1108_v47 = vpop.f32.mrf.mxu0 }
 0x1cd   :  { %v359_v48 = vmul.f32 0.5, %v358_v46 }
 0x1cf   :  { %1327 = vtanh.f32 %v359_v48 }
 0x1dc   :  { %v1328_v49 = vpop.eup %1327 }
 0x1dd   :  { %v361_v50 = vmul.f32 0.5, %v1328_v49 }
 0x1df   :  { %v362_v51 = vadd.f32 0.5, %v361_v50 }
 0x1e1   :  { %v364_v53 = vmul.f32 0.02, %v362_v51 }
 0x1e3   :  { %v365_v54 = vadd.f32 %v364_v53, %v363_v52 }
 0x1e5   :  { %366 = vst [vmem:[#allocation6 + $0x8] sm:$0xff] %v365_v54  ;;  %1142 = vmatmul.mubr.f32.vlgmr.msra.gmra.mxu1 %v365_v54  ;;  %v444_v62 = vmul.f32 0.98, %v365_v54 }
 0x1e6   :  { %1180 = vmatpush3.msra.mxu1 %v1425_v1  ;;  %1211 = vmatprep.mubr.msk.f32.mxu1 %vm1389_vm0, %v1388_v0 }
 0x1e7   :  { %1181 = vmatprep.subr.mxu1 %v1388_v0 }
 0x1e8   :  { %1182 = vmatpush3.msra.mxu1 %v1427_v2 }
 0x1e9   :  { %1183 = vmatprep.subr.mxu1 %v1388_v0 }
 0x1ea   :  { %1184 = vmatpush3.msra.mxu1 %v1431_v3 }
 0x1eb   :  { %1185 = vmatprep.subr.mxu1 %v1388_v0 }
 0x1ec   :  { %1186 = vmatpush3.msra.mxu1 %v1441_v6 }
 0x1ed   :  { %1187 = vmatprep.subr.mxu1 %v1388_v0 }
 0x1ee   :  { %1188 = vmatpush3.msra.mxu1 %v1448_v8 }
 0x1ef   :  { %1189 = vmatprep.subr.mxu1 %v1388_v0 }
 0x1f0   :  { %1190 = vmatpush3.msra.mxu1 %v1454_v9 }
 0x1f1   :  { %1191 = vmatprep.subr.mxu1 %v1388_v0 }
 0x1f2   :  { %1192 = vmatpush3.msra.mxu1 %v1460_v10 }
 0x1f3   :  { %1193 = vmatprep.subr.mxu1 %v1388_v0 }
 0x1f4   :  { %1194 = vmatpush3.msra.mxu1 %v1466_v11 }
 0x1f5   :  { %1195 = vmatprep.subr.mxu1 %v1388_v0 }
 0x1f6   :  { %1196 = vmatpush3.msra.mxu1 %v1472_v12 }
 0x1f7   :  { %1197 = vmatprep.subr.mxu1 %v1388_v0 }
 0x1f8   :  { %1198 = vmatpush3.msra.mxu1 %v1478_v13 }
 0x1f9   :  { %1199 = vmatprep.subr.mxu1 %v1388_v0 }
 0x1fa   :  { %1200 = vmatpush3.msra.mxu1 %v1484_v14 }
 0x1fb   :  { %1201 = vmatprep.subr.mxu1 %v1388_v0 }
 0x1fc   :  { %1202 = vmatpush3.msra.mxu1 %v1490_v15 }
 0x1fd   :  { %1203 = vmatprep.subr.mxu1 %v1388_v0 }
 0x1fe   :  { %1204 = vmatpush3.msra.mxu1 %v1496_v16 }
 0x1ff   :  { %1205 = vmatprep.subr.mxu1 %v1388_v0 }
 0x200   :  { %1206 = vmatpush3.msra.mxu1 %v1502_v17 }
 0x201   :  { %1207 = vmatprep.subr.mxu1 %v1388_v0 }
 0x202   :  { %1208 = vmatpush3.msra.mxu1 %v1508_v18 }
 0x203   :  { %1209 = vmatprep.subr.mxu1 %v1388_v0 }
 0x204   :  { %1210 = vmatpush3.msra.mxu1 %v1514_v19 }
 0x205   :  { %1249 = vmatprep.subr.mxu1 %v1388_v0 }
 0x2a5   :  { %v435_v55 = vpop.f32.mrf.mxu1 }
 0x2a6   :  { %v439_v56 = vadd.f32 %v435_v55, %v152_v40 }
 0x2a7   :  { %v1143_v57 = vpop.f32.mrf.mxu1 }
 0x2a8   :  { %v440_v58 = vmul.f32 0.5, %v439_v56 }
 0x2aa   :  { %1329 = vtanh.f32 %v440_v58 }
 0x2b7   :  { %v1330_v59 = vpop.eup %1329 }
 0x2b8   :  { %v442_v60 = vmul.f32 0.5, %v1330_v59 }
 0x2ba   :  { %v443_v61 = vadd.f32 0.5, %v442_v60 }
 0x2bc   :  { %v445_v63 = vmul.f32 0.02, %v443_v61 }
 0x2be   :  { %v446_v4 = vadd.f32 %v445_v63, %v444_v62 }
 0x2c0   :  { %447 = vst [vmem:[#allocation6 + $0x10] sm:$0xff] %v446_v4  ;;  %1177 = vmatmul.mubr.f32.vlgmr.msra.gmra.mxu0 %v446_v4  ;;  %v525_v25 = vmul.f32 0.98, %v446_v4 }
 0x2c1   :  { %1215 = vmatpush3.msra.mxu0 %v1425_v1  ;;  %1246 = vmatprep.mubr.msk.f32.mxu0 %vm1389_vm0, %v1388_v0 }
 0x2c2   :  { %1216 = vmatprep.subr.mxu0 %v1388_v0 }
 0x2c3   :  { %1217 = vmatpush3.msra.mxu0 %v1427_v2 }
 0x2c4   :  { %1218 = vmatprep.subr.mxu0 %v1388_v0 }
 0x2c5   :  { %1219 = vmatpush3.msra.mxu0 %v1431_v3 }
 0x2c6   :  { %1220 = vmatprep.subr.mxu0 %v1388_v0 }
 0x2c7   :  { %1221 = vmatpush3.msra.mxu0 %v1441_v6 }
 0x2c8   :  { %1222 = vmatprep.subr.mxu0 %v1388_v0 }
 0x2c9   :  { %1223 = vmatpush3.msra.mxu0 %v1448_v8 }
 0x2ca   :  { %1224 = vmatprep.subr.mxu0 %v1388_v0 }
 0x2cb   :  { %1225 = vmatpush3.msra.mxu0 %v1454_v9 }
 0x2cc   :  { %1226 = vmatprep.subr.mxu0 %v1388_v0 }
 0x2cd   :  { %1227 = vmatpush3.msra.mxu0 %v1460_v10 }
 0x2ce   :  { %1228 = vmatprep.subr.mxu0 %v1388_v0 }
 0x2cf   :  { %1229 = vmatpush3.msra.mxu0 %v1466_v11 }
 0x2d0   :  { %1230 = vmatprep.subr.mxu0 %v1388_v0 }
 0x2d1   :  { %1231 = vmatpush3.msra.mxu0 %v1472_v12 }
 0x2d2   :  { %1232 = vmatprep.subr.mxu0 %v1388_v0 }
 0x2d3   :  { %1233 = vmatpush3.msra.mxu0 %v1478_v13 }
 0x2d4   :  { %1234 = vmatprep.subr.mxu0 %v1388_v0 }
 0x2d5   :  { %1235 = vmatpush3.msra.mxu0 %v1484_v14 }
 0x2d6   :  { %1236 = vmatprep.subr.mxu0 %v1388_v0 }
 0x2d7   :  { %1237 = vmatpush3.msra.mxu0 %v1490_v15 }
 0x2d8   :  { %1238 = vmatprep.subr.mxu0 %v1388_v0 }
 0x2d9   :  { %1239 = vmatpush3.msra.mxu0 %v1496_v16 }
 0x2da   :  { %1240 = vmatprep.subr.mxu0 %v1388_v0 }
 0x2db   :  { %1241 = vmatpush3.msra.mxu0 %v1502_v17 }
 0x2dc   :  { %1242 = vmatprep.subr.mxu0 %v1388_v0 }
 0x2dd   :  { %1243 = vmatpush3.msra.mxu0 %v1508_v18 }
 0x2de   :  { %1244 = vmatprep.subr.mxu0 %v1388_v0 }
 0x2df   :  { %1245 = vmatpush3.msra.mxu0 %v1514_v19 }
 0x2e0   :  { %1284 = vmatprep.subr.mxu0 %v1388_v0 }
 0x380   :  { %v516_v5 = vpop.f32.mrf.mxu0 }
 0x381   :  { %v520_v7 = vadd.f32 %v1634_v39, %v516_v5 }
 0x382   :  { %v1178_v20 = vpop.f32.mrf.mxu0 }
 0x383   :  { %v521_v21 = vmul.f32 0.5, %v520_v7 }
 0x385   :  { %1331 = vtanh.f32 %v521_v21 }
 0x392   :  { %v1332_v22 = vpop.eup %1331 }
 0x393   :  { %v523_v23 = vmul.f32 0.5, %v1332_v22 }
 0x395   :  { %v524_v24 = vadd.f32 0.5, %v523_v23 }
 0x397   :  { %v526_v26 = vmul.f32 0.02, %v524_v24 }
 0x399   :  { %v527_v27 = vadd.f32 %v526_v26, %v525_v25 }
 0x39b   :  { %528 = vst [vmem:[#allocation6 + $0x18] sm:$0xff] %v527_v27  ;;  %1212 = vmatmul.mubr.f32.vlgmr.msra.gmra.mxu1 %v527_v27  ;;  %v606_v35 = vmul.f32 0.98, %v527_v27 }
 0x39c   :  { %1250 = vmatpush3.msra.mxu1 %v1425_v1  ;;  %1281 = vmatprep.mubr.msk.f32.mxu1 %vm1389_vm0, %v1388_v0 }
 0x39d   :  { %1251 = vmatprep.subr.mxu1 %v1388_v0 }
 0x39e   :  { %1252 = vmatpush3.msra.mxu1 %v1427_v2 }
 0x39f   :  { %1253 = vmatprep.subr.mxu1 %v1388_v0 }
 0x3a0   :  { %1254 = vmatpush3.msra.mxu1 %v1431_v3 }
 0x3a1   :  { %1255 = vmatprep.subr.mxu1 %v1388_v0 }
 0x3a2   :  { %1256 = vmatpush3.msra.mxu1 %v1441_v6 }
 0x3a3   :  { %1257 = vmatprep.subr.mxu1 %v1388_v0 }
 0x3a4   :  { %1258 = vmatpush3.msra.mxu1 %v1448_v8 }
 0x3a5   :  { %1259 = vmatprep.subr.mxu1 %v1388_v0 }
 0x3a6   :  { %1260 = vmatpush3.msra.mxu1 %v1454_v9 }
 0x3a7   :  { %1261 = vmatprep.subr.mxu1 %v1388_v0 }
 0x3a8   :  { %1262 = vmatpush3.msra.mxu1 %v1460_v10 }
 0x3a9   :  { %1263 = vmatprep.subr.mxu1 %v1388_v0 }
 0x3aa   :  { %1264 = vmatpush3.msra.mxu1 %v1466_v11 }
 0x3ab   :  { %1265 = vmatprep.subr.mxu1 %v1388_v0 }
 0x3ac   :  { %1266 = vmatpush3.msra.mxu1 %v1472_v12 }
 0x3ad   :  { %1267 = vmatprep.subr.mxu1 %v1388_v0 }
 0x3ae   :  { %1268 = vmatpush3.msra.mxu1 %v1478_v13 }
 0x3af   :  { %1269 = vmatprep.subr.mxu1 %v1388_v0 }
 0x3b0   :  { %1270 = vmatpush3.msra.mxu1 %v1484_v14 }
 0x3b1   :  { %1271 = vmatprep.subr.mxu1 %v1388_v0 }
 0x3b2   :  { %1272 = vmatpush3.msra.mxu1 %v1490_v15 }
 0x3b3   :  { %1273 = vmatprep.subr.mxu1 %v1388_v0 }
 0x3b4   :  { %1274 = vmatpush3.msra.mxu1 %v1496_v16 }
 0x3b5   :  { %1275 = vmatprep.subr.mxu1 %v1388_v0 }
 0x3b6   :  { %1276 = vmatpush3.msra.mxu1 %v1502_v17 }
 0x3b7   :  { %1277 = vmatprep.subr.mxu1 %v1388_v0 }
 0x3b8   :  { %1278 = vmatpush3.msra.mxu1 %v1508_v18 }
 0x3b9   :  { %1279 = vmatprep.subr.mxu1 %v1388_v0 }
 0x3ba   :  { %1280 = vmatpush3.msra.mxu1 %v1514_v19 }
 0x45b   :  { %v597_v28 = vpop.f32.mrf.mxu1 }
 0x45c   :  { %v601_v29 = vadd.f32 %v597_v28, %v1638_v42 }
 0x45d   :  { %v1213_v30 = vpop.f32.mrf.mxu1 }
 0x45e   :  { %v602_v31 = vmul.f32 0.5, %v601_v29 }
 0x460   :  { %1333 = vtanh.f32 %v602_v31 }
 0x46d   :  { %v1334_v32 = vpop.eup %1333 }
 0x46e   :  { %v604_v33 = vmul.f32 0.5, %v1334_v32 }
 0x470   :  { %v605_v34 = vadd.f32 0.5, %v604_v33 }
 0x472   :  { %v607_v36 = vmul.f32 0.02, %v605_v34 }
 0x474   :  { %v608_v37 = vadd.f32 %v607_v36, %v606_v35 }
 0x476   :  { %609 = vst [vmem:[#allocation6 + $0x20] sm:$0xff] %v608_v37  ;;  %1247 = vmatmul.mubr.f32.vlgmr.msra.gmra.mxu0 %v608_v37 }
 0x477   :  { %1285 = vmatpush3.msra.mxu0 %v1425_v1  ;;  %1316 = vmatprep.mubr.msk.f32.mxu0 %vm1389_vm0, %v1388_v0 }
 0x478   :  { %1286 = vmatprep.subr.mxu0 %v1388_v0 }
 0x479   :  { %1287 = vmatpush3.msra.mxu0 %v1427_v2 }
 0x47a   :  { %1288 = vmatprep.subr.mxu0 %v1388_v0 }
 0x47b   :  { %1289 = vmatpush3.msra.mxu0 %v1431_v3 }
 0x47c   :  { %1290 = vmatprep.subr.mxu0 %v1388_v0 }
 0x47d   :  { %1291 = vmatpush3.msra.mxu0 %v1441_v6 }
 0x47e   :  { %1292 = vmatprep.subr.mxu0 %v1388_v0 }
 0x47f   :  { %1293 = vmatpush3.msra.mxu0 %v1448_v8 }
 0x480   :  { %1294 = vmatprep.subr.mxu0 %v1388_v0 }
 0x481   :  { %1295 = vmatpush3.msra.mxu0 %v1454_v9 }
 0x482   :  { %1296 = vmatprep.subr.mxu0 %v1388_v0 }
 0x483   :  { %1297 = vmatpush3.msra.mxu0 %v1460_v10 }
 0x484   :  { %1298 = vmatprep.subr.mxu0 %v1388_v0 }
 0x485   :  { %1299 = vmatpush3.msra.mxu0 %v1466_v11  ;;  %v687_v11 = vmul.f32 0.98, %v608_v37 }
 0x486   :  { %1300 = vmatprep.subr.mxu0 %v1388_v0 }
 0x487   :  { %1301 = vmatpush3.msra.mxu0 %v1472_v12 }
 0x488   :  { %1302 = vmatprep.subr.mxu0 %v1388_v0 }
 0x489   :  { %1303 = vmatpush3.msra.mxu0 %v1478_v13 }
 0x48a   :  { %1304 = vmatprep.subr.mxu0 %v1388_v0 }
 0x48b   :  { %1305 = vmatpush3.msra.mxu0 %v1484_v14 }
 0x48c   :  { %1306 = vmatprep.subr.mxu0 %v1388_v0 }
 0x48d   :  { %1307 = vmatpush3.msra.mxu0 %v1490_v15 }
 0x48e   :  { %1308 = vmatprep.subr.mxu0 %v1388_v0 }
 0x48f   :  { %1309 = vmatpush3.msra.mxu0 %v1496_v16 }
 0x490   :  { %1310 = vmatprep.subr.mxu0 %v1388_v0 }
 0x491   :  { %1311 = vmatpush3.msra.mxu0 %v1502_v17 }
 0x492   :  { %1312 = vmatprep.subr.mxu0 %v1388_v0 }
 0x493   :  { %1313 = vmatpush3.msra.mxu0 %v1508_v18 }
 0x494   :  { %1314 = vmatprep.subr.mxu0 %v1388_v0 }
 0x495   :  { %1315 = vmatpush3.msra.mxu0 %v1514_v19 }
 0x536   :  { %v678_v1 = vpop.f32.mrf.mxu0 }
 0x537   :  { %v682_v2 = vadd.f32 %v1636_v41, %v678_v1 }
 0x538   :  { %v1248_v3 = vpop.f32.mrf.mxu0 }
 0x539   :  { %v683_v6 = vmul.f32 0.5, %v682_v2 }
 0x53b   :  { %1335 = vtanh.f32 %v683_v6 }
 0x548   :  { %v1336_v8 = vpop.eup %1335 }
 0x549   :  { %v685_v9 = vmul.f32 0.5, %v1336_v8 }
 0x54b   :  { %v686_v10 = vadd.f32 0.5, %v685_v9 }
 0x54d   :  { %v688_v12 = vmul.f32 0.02, %v686_v10 }
 0x54f   :  { %v689_v13 = vadd.f32 %v688_v12, %v687_v11 }
 0x551   :  { %690 = vst [vmem:[#allocation6 + $0x28] sm:$0xff] %v689_v13  ;;  %1282 = vmatmul.mubr.f32.vlgmr.msra.gmra.mxu1 %v689_v13  ;;  %v768_v38 = vmul.f32 0.98, %v689_v13 }
 0x611   :  { %v759_v14 = vpop.f32.mrf.mxu1 }
 0x612   :  { %v763_v15 = vadd.f32 %v759_v14, %v1642_v44 }
 0x613   :  { %v1283_v0 = vpop.f32.mrf.mxu1 }
 0x614   :  { %v764_v16 = vmul.f32 0.5, %v763_v15 }
 0x616   :  { %1337 = vtanh.f32 %v764_v16 }
 0x623   :  { %v1338_v17 = vpop.eup %1337 }
 0x624   :  { %v766_v18 = vmul.f32 0.5, %v1338_v17 }
 0x626   :  { %v767_v19 = vadd.f32 0.5, %v766_v18 }
 0x628   :  { %v769_v39 = vmul.f32 0.02, %v767_v19 }
 0x62a   :  { %v770_v40 = vadd.f32 %v769_v39, %v768_v38 }
 0x62c   :  { %771 = vst [vmem:[#allocation6 + $0x30] sm:$0xff] %v770_v40  ;;  %1317 = vmatmul.mubr.f32.vlgmr.msra.gmra.mxu0 %v770_v40  ;;  %v849_v49 = vmul.f32 0.98, %v770_v40 }
 0x6ec   :  { %v840_v41 = vpop.f32.mrf.mxu0 }
 0x6ed   :  { %v844_v42 = vadd.f32 %v1640_v43, %v840_v41 }
 0x6ee   :  { %v1318_v45 = vpop.f32.mrf.mxu0 }
 0x6ef   :  { %v845_v46 = vmul.f32 0.5, %v844_v42 }
 0x6f1   :  { %1339 = vtanh.f32 %v845_v46 }
 0x6fe   :  { %v1340_v47 = vpop.eup %1339 }
 0x6ff   :  { %v847_v48 = vmul.f32 0.5, %v1340_v47 }
 0x701   :  { %v848_v44 = vadd.f32 0.5, %v847_v48 }
 0x703   :  { %v850_v50 = vmul.f32 0.02, %v848_v44 }
 0x705   :  { %v851_v51 = vadd.f32 %v850_v50, %v849_v49 }
 0x707   :  { %852 = vst [vmem:[#allocation6 + $0x38] sm:$0xff] %v851_v51 }
 0x708   :  { %1372 = shalt.err (!%p1369_p9)
}
 0x709   :  { %865 = dma.vmem_to_hbm [thread:$0]  %s860_s13, 1024, %s1793_s4, [#allocation5], %s1386_s18, %s1386_s18, %s1387_s19  }
 0x70a   :  { %1383 = dma.done.wait [#allocation5], 1024  }
 0x70b   :  { %1384 = vsyncadd [#allocation5], 4294966272 }
 0x70c   :  { %869 = vsyncpa [#allocation4], 1 }
 0x70d   :  { %870 = vsyncpa [#allocation5], 1 }

</bundles_post_ra>
